<compile_context>
chip_gen: v6e
topology: v6e:2x2x1
jax: 0.10.0
libtpu: 0.0.40
codegen_flags: <defaults>
</compile_context>

<pallas_src>
import math

import jax
import jax.numpy as jnp
from jax.experimental import pallas as pl
from jax.experimental.pallas import tpu as pltpu


# ---------------------------------------------------------------------------
# Kernel
# ---------------------------------------------------------------------------
def _linear_kernel(x_ref, w_ref, b_ref, o_ref):
    # x_ref: (bm, Kp)  w_ref: (Kp, Np)  b_ref: (1, Np) f32  o_ref: (bm, Np)
    x = x_ref[...]
    if x.dtype != w_ref.dtype:           # in-kernel cast (e.g. f32 act -> bf16 MXU in)
        x = x.astype(w_ref.dtype)
    acc = jnp.dot(x, w_ref[...], preferred_element_type=jnp.float32)
    o_ref[...] = (acc + b_ref[...]).astype(o_ref.dtype)


# ---------------------------------------------------------------------------
# Helpers
# ---------------------------------------------------------------------------
def _round_up(v, m):
    return ((v + m - 1) // m) * m


def _sublane_multiple(dtype):
    # f32 -> 8, bf16 -> 16, int8/fp8 -> 32 (sub-32-bit dtypes pack along sublanes)
    return max(8, 32 // jnp.dtype(dtype).itemsize)


def _num_tensorcores():
    """Best-effort TC-per-chip detection (v7x has 2, v5e/v6e have 1)."""
    try:
        info = pltpu.get_tpu_info()
        for name in ("num_cores", "cores_per_chip", "num_tensorcores",
                     "tensorcores_per_chip"):
            v = getattr(info, name, None)
            if isinstance(v, int) and v > 0:
                return v
    except Exception:
        pass
    return 1


def _pack_factor(dim_in, emb_dim, w_itemsize, max_w_bytes):
    """Smallest pack making both pack*dim_in and pack*emb_dim multiples of 128."""
    need_k = 128 // math.gcd(dim_in, 128)
    need_n = 128 // math.gcd(emb_dim, 128)
    pack = (need_k * need_n) // math.gcd(need_k, need_n)   # lcm

    def w_bytes(p):
        return (p * dim_in) * (p * emb_dim) * w_itemsize

    if pack > 1 and (pack > 128 or w_bytes(pack) > max_w_bytes):
        # Too big to make both sides lane-dense: at least make the output side dense.
        pack = need_n
        if pack > 128 or w_bytes(pack) > max_w_bytes:
            pack = 1
    return pack


def _choose_block_rows(rows, per_row_bytes, acc_row_bytes, w_bytes, sub, num_cores,
                       target_step_bytes=3 << 20, vmem_budget=10 << 20):
    """Packed-row tile size: MiB-scale steps, double-buffered VMEM budget,
    sublane-aligned, and split across TCs only when the chip has >1."""
    if rows <= sub:
        return rows
    bm = max(sub, target_step_bytes // per_row_bytes)
    cap = max(sub, (vmem_budget - w_bytes) // (2 * per_row_bytes + acc_row_bytes))
    bm = min(bm, cap)
    if num_cores > 1:
        bm = min(bm, _round_up(pl.cdiv(rows, num_cores), sub))
    if bm >= rows:
        return rows                       # full extent: always a legal block shape
    return max(sub, (bm // sub) * sub)


# ---------------------------------------------------------------------------
# One-time parameter preparation (hoisted out of the forward pass)
# ---------------------------------------------------------------------------
def prepare_encoder_params(weight, bias, *, lane_pack=None, param_dtype=None,
                           max_packed_w_bytes=2 << 20):
    """Convert torch.nn.Linear params (weight [emb_dim, dim_in], bias [emb_dim])
    into the kernel layout:
      w: [pack*dim_in, pack*emb_dim]  block-diagonal W^T (lane-dense in AND out)
      b: [1, pack*emb_dim]            f32 bias, tiled `pack` times
    """
    emb_dim, dim_in = weight.shape
    w_dtype = param_dtype if param_dtype is not None else weight.dtype
    itemsize = jnp.dtype(w_dtype).itemsize

    if lane_pack is None:
        lane_pack = _pack_factor(dim_in, emb_dim, itemsize, max_packed_w_bytes)
    lane_pack = max(1, int(lane_pack))

    w_t = weight.T.astype(w_dtype)                       # [dim_in, emb_dim]
    b_row = bias.astype(jnp.float32).reshape(1, emb_dim)

    if lane_pack > 1:
        eye = jnp.eye(lane_pack, dtype=w_t.dtype)
        w_k = jnp.kron(eye, w_t)                         # [pack*dim_in, pack*emb_dim]
        b_k = jnp.tile(b_row, (1, lane_pack))            # [1, pack*emb_dim]
    else:
        w_k, b_k = w_t, b_row

    return {"w": w_k, "b": b_k, "dim_in": dim_in, "emb_dim": emb_dim,
            "pack": lane_pack}


# ---------------------------------------------------------------------------
# Forward: y = x @ W^T + b   (the LinearNodeEncoder body)
# ---------------------------------------------------------------------------
def linear_node_encoder(x, params, *, out_dtype=None, num_cores=None):
    """x: [num_nodes, dim_in] -> [num_nodes, emb_dim] (dtype = out_dtype or x.dtype)."""
    num_nodes, dim_in = x.shape
    assert dim_in == params["dim_in"]
    emb_dim = params["emb_dim"]
    pack = params["pack"]
    out_dtype = out_dtype if out_dtype is not None else x.dtype
    if num_cores is None:
        num_cores = _num_tensorcores()

    w, b = params["w"], params["b"]

    if pack > 1:
        # Lane-dense path: `pack` node rows per output row; pad <= pack-1 rows.
        rem = num_nodes % pack
        x_p = jnp.pad(x, ((0, pack - rem), (0, 0))) if rem else x
        rows = x_p.shape[0] // pack
        kp, np_ = pack * dim_in, pack * emb_dim
        x_in = x_p.reshape(rows, kp)      # row-major relabel, no real data movement
    else:
        rem = 0
        rows, kp, np_ = num_nodes, dim_in, emb_dim
        x_in = x

    sub = max(_sublane_multiple(x.dtype), _sublane_multiple(out_dtype))
    per_row = kp * jnp.dtype(x.dtype).itemsize + np_ * jnp.dtype(out_dtype).itemsize
    acc_row = np_ * 4
    w_bytes = w.size * jnp.dtype(w.dtype).itemsize + b.size * 4
    bm = _choose_block_rows(rows, per_row, acc_row, w_bytes, sub, num_cores)
    grid = (pl.cdiv(rows, bm),)           # ragged last block masked by Pallas

    out = pl.pallas_call(
        _linear_kernel,
        out_shape=jax.ShapeDtypeStruct((rows, np_), out_dtype),
        grid_spec=pltpu.PrefetchScalarGridSpec(
            num_scalar_prefetch=0,
            grid=grid,
            in_specs=[
                pl.BlockSpec((bm, kp), lambda i: (i, 0)),    # x row tile (lane-dense)
                pl.BlockSpec((kp, np_), lambda i: (0, 0)),   # block-diag W, VMEM-resident
                pl.BlockSpec((1, np_), lambda i: (0, 0)),    # f32 bias row
            ],
            out_specs=pl.BlockSpec((bm, np_), lambda i: (i, 0)),
        ),
        compiler_params=pltpu.CompilerParams(
            dimension_semantics=("parallel",),
        ),
    )(x_in, w, b)

    out = out.reshape(rows * pack, emb_dim) if pack > 1 else out
    if rem:
        out = out[:num_nodes]
    return out


# ---------------------------------------------------------------------------
# torch.nn.Linear default init (U(-1/sqrt(fan_in), 1/sqrt(fan_in)))
# ---------------------------------------------------------------------------
def init_linear_params(key, emb_dim, dim_in, dtype=jnp.float32):
    kw, kb = jax.random.split(key)
    bound = 1.0 / math.sqrt(dim_in)
    weight = jax.random.uniform(kw, (emb_dim, dim_in), dtype=dtype,
                                minval=-bound, maxval=bound)
    bias = jax.random.uniform(kb, (emb_dim,), dtype=dtype,
                              minval=-bound, maxval=bound)
    return weight, bias


if __name__ == "__main__":
    key = jax.random.PRNGKey(0)
    k_x, k_p = jax.random.split(key)

    # Module-consistent small shapes: 200 graph nodes, dim_in=16, emb_dim=32.
    num_nodes, dim_in, emb_dim = 200, 16, 32

    x = jax.random.normal(k_x, (num_nodes, dim_in), dtype=jnp.float32)
    weight, bias = init_linear_params(k_p, emb_dim, dim_in)
    y_ref = x @ weight.T + bias

    # 1) f32 params; pack=8 -> kp=128, np_=256 (lane-dense loads AND stores).
    params_f32 = prepare_encoder_params(weight, bias)
    assert params_f32["pack"] == 8
    y = jax.block_until_ready(linear_node_encoder(x, params_f32))
    assert y.shape == (num_nodes, emb_dim)
    assert jnp.allclose(y, y_ref, atol=1e-5, rtol=1e-5)

    # 2) Ragged node count (203): pad 5 rows, keep the lane-dense path, slice output.
    x2 = jax.random.normal(k_x, (203, dim_in), dtype=jnp.float32)
    y2 = jax.block_until_ready(linear_node_encoder(x2, params_f32))
    assert y2.shape == (203, emb_dim)
    assert jnp.allclose(y2, x2 @ weight.T + bias, atol=1e-5, rtol=1e-5)

    # 3) bf16 weights (in-kernel activation cast, f32 accumulate) + bf16 output.
    #    NOTE: activations are cast to bf16 for the MXU, so results differ slightly
    #    from torch.nn.Linear with fp32 inputs (intentional trade-off).
    params_bf16 = prepare_encoder_params(weight, bias, param_dtype=jnp.bfloat16)
    y3 = jax.block_until_ready(
        linear_node_encoder(x, params_bf16, out_dtype=jnp.bfloat16))
    assert y3.shape == (num_nodes, emb_dim) and y3.dtype == jnp.bfloat16
    assert jnp.allclose(y3.astype(jnp.float32), y_ref, atol=5e-2, rtol=5e-2)

    print("KERNEL_OK")
</pallas_src>

<mosaic_0001>
module attributes {stable_mosaic.version = 11 : i64} {
  func.func @_linear_kernel(%arg0: i32, %arg1: memref<25x128xf32, #tpu.memory_space<vmem>>, %arg2: memref<128x256xf32, #tpu.memory_space<vmem>>, %arg3: memref<1x256xf32, #tpu.memory_space<vmem>>, %arg4: memref<25x256xf32, #tpu.memory_space<vmem>>) attributes {dimension_semantics = [#tpu.dimension_semantics<parallel>], iteration_bounds = array<i64: 1>, scalar_prefetch = 0 : i64, scratch_operands = 0 : i64, tpu.core_type = #tpu.core_type<tc>, window_params = [{transform_indices = @transform_0, window_bounds = array<i64: 25, 128>}, {pipeline_mode = #tpu.pipeline_mode<synchronous>, transform_indices = @transform_1, window_bounds = array<i64: 128, 256>}, {pipeline_mode = #tpu.pipeline_mode<synchronous>, transform_indices = @transform_2, window_bounds = array<i64: 1, 256>}, {transform_indices = @transform_3, window_bounds = array<i64: 25, 256>}]} {
    %c0 = arith.constant 0 : index
    %c0_0 = arith.constant 0 : index
    %0 = vector.load %arg1[%c0, %c0_0] : memref<25x128xf32, #tpu.memory_space<vmem>>, vector<25x128xf32>
    %c0_1 = arith.constant 0 : index
    %c0_2 = arith.constant 0 : index
    %1 = vector.load %arg2[%c0_1, %c0_2] : memref<128x256xf32, #tpu.memory_space<vmem>>, vector<128x256xf32>
    %cst = arith.constant dense<0.000000e+00> : vector<25x256xf32>
    %2 = tpu.matmul %0, %1, %cst {dimension_numbers = #tpu.dot_dimension_numbers<[1], [0], [0], [1], [0, 0, 1, 1], [], []>} : vector<25x128xf32>, vector<128x256xf32>, vector<25x256xf32> -> vector<25x256xf32>
    %c0_3 = arith.constant 0 : index
    %c0_4 = arith.constant 0 : index
    %3 = vector.load %arg3[%c0_3, %c0_4] : memref<1x256xf32, #tpu.memory_space<vmem>>, vector<1x256xf32>
    %4 = vector.broadcast %3 : vector<1x256xf32> to vector<25x256xf32>
    %5 = arith.addf %2, %4 : vector<25x256xf32>
    %c0_5 = arith.constant 0 : index
    %c0_6 = arith.constant 0 : index
    %6 = vector.load %arg4[%c0_5, %c0_6] : memref<25x256xf32, #tpu.memory_space<vmem>>, vector<25x256xf32>
    tpu.vector_store %arg4[%c0_5, %c0_6], %5 {strides = array<i32>} : memref<25x256xf32, #tpu.memory_space<vmem>>, vector<25x256xf32>,
    return
  }
  func.func @transform_0(%arg0: i32) -> (i32, i32) {
    %c0_i32 = arith.constant 0 : i32
    %c0_i32_0 = arith.constant 0 : i32
    return %arg0, %c0_i32 : i32, i32
  }
  func.func @transform_1(%arg0: i32) -> (i32, i32) {
    %c0_i32 = arith.constant 0 : i32
    %c0_i32_0 = arith.constant 0 : i32
    %c0_i32_1 = arith.constant 0 : i32
    return %c0_i32, %c0_i32_0 : i32, i32
  }
  func.func @transform_2(%arg0: i32) -> (i32, i32) {
    %c0_i32 = arith.constant 0 : i32
    %c0_i32_0 = arith.constant 0 : i32
    %c0_i32_1 = arith.constant 0 : i32
    return %c0_i32, %c0_i32_0 : i32, i32
  }
  func.func @transform_3(%arg0: i32) -> (i32, i32) {
    %c0_i32 = arith.constant 0 : i32
    %c0_i32_0 = arith.constant 0 : i32
    return %arg0, %c0_i32 : i32, i32
  }
}

</mosaic_0001>

<bundles_post_ra>
// kernel: tpu_custom_call.1
= control target key start
LH: loop header
LB: loop body
LE: loop exit
PB: predicated region body
PF: predicated region fallthrough
CT: control target
= control target key end

     0   :  { %8 = vsyncpa [#allocation3], 0  ;;  %s362_s0 = inlined_call_operand.hbm [shape: f32[25,128], index: 0, kind: input, shape index: {}]   ;;  %s363_s1 = inlined_call_operand.hbm [shape: f32[128,256], index: 1, kind: input, shape index: {}]   ;;  %s364_s2 = inlined_call_operand.vmem [shape: f32[1,256], index: 2, kind: input, shape index: {}]   ;;  %s365_s3 = inlined_call_operand.hbm [shape: f32[25,256], index: 3, kind: output, shape index: {}]  }
   0x1   :  { %9 = vsyncpa [#allocation6], 0 }
   0x2   :  { %10 = vsyncpa [#allocation4], 0  ;;  %s312_s12 = smov [#allocation2]  }
   0x3   :  { %s16_s13 = sshll.u32 %s312_s12, 4  ;;  %s17_s13 = int_to_ptr.vmem [resolvable:$true] %s16_s13 }
   0x4   :  { %s254_s14 = scalar_lea.vmem %s17_s13, 512  ;;  %p259_p1 = scmp.lt.s32.totalorder %s17_s13, %s17_s13 }
   0x5   :  { %p255_p0 = scmp.ne.s32.totalorder %s17_s13, %s254_s14  ;;  %p260_p2 = scmp.lt.s32.totalorder %s254_s14, %s254_s14 }
   0x7   :  { %p261_p3 = por %p260_p2, %p259_p1 }
   0x9   :  { %p262_p4 = pnand %p261_p3, %p255_p0 }
   0xb   :  { %265 = shalt.err (!%p262_p4)
}
   0xc   :  { %s313_s15 = smov 128   ;;  %s314_s16 = smov 8  }
   0xd   :  { %22 = dma.hbm_to_vmem [thread:$0]  %s362_s0, 512, %s17_s13, [#allocation3], %s313_s15, %s313_s15, %s314_s16  }
   0xe   :  { %s315_s19 = smov [#allocation5]  }
   0xf   :  { %s28_s20 = sshll.u32 %s315_s19, 4  ;;  %s29_s20 = int_to_ptr.vmem [resolvable:$true] %s28_s20 }
  0x10   :  { %s274_s21 = scalar_lea.vmem %s29_s20, 4096  ;;  %p279_p6 = scmp.lt.s32.totalorder %s29_s20, %s29_s20 }
  0x11   :  { %p275_p5 = scmp.ne.s32.totalorder %s29_s20, %s274_s21  ;;  %p280_p7 = scmp.lt.s32.totalorder %s274_s21, %s274_s21 }
  0x13   :  { %p281_p8 = por %p280_p7, %p279_p6 }
  0x15   :  { %p282_p9 = pnand %p281_p8, %p275_p5 }
  0x17   :  { %285 = shalt.err (!%p282_p9)
}
  0x18   :  { %s316_s22 = smov 256   ;;  %s317_s23 = smov 16  }
  0x19   :  { %34 = dma.hbm_to_vmem [thread:$0]  %s363_s1, 4096, %s29_s20, [#allocation6], %s316_s22, %s316_s22, %s317_s23  }
  0x1a   :  { %306 = dma.done.wait [#allocation3], 512  }
  0x1b   :  { %307 = vsyncadd [#allocation3], 4294966784 }
  0x1c   :  { %308 = dma.done.wait [#allocation6], 4096  }
  0x1d   :  { %309 = vsyncadd [#allocation6], 4294963200  ;;  %v318_v0 = vmov 0.0   ;;  %v78_v1 = vld [vmem:[#allocation5 + $0xf8] sm:$0xff]  ;;  %v77_v2 = vld [vmem:[#allocation5 + $0xf0] sm:$0xff]  ;;  %v81_v37 = vlaneseq  ;;  %s319_s26 = smov [#allocation7]  }
  0x1e   :  { %155 = vmatprep.mubr.f32.mxu0 %v318_v0  ;;  %167 = vmatprep.mubr.f32.mxu1 %v318_v0  ;;  %v76_v3 = vld [vmem:[#allocation5 + $0xe8] sm:$0xff]  ;;  %v75_v4 = vld [vmem:[#allocation5 + $0xe0] sm:$0xff]  ;;  %v74_v5 = vld [vmem:[#allocation5 + $0xd8] sm:$0xff]  ;;  %s193_s27 = sshll.u32 %s319_s26, 4  ;;  %s194_s27 = int_to_ptr.vmem [resolvable:$true] %s193_s27 }
  0x1f   :  { %91 = vmatprep.subr.mxu0 %v78_v1  ;;  %206 = vmatprep.subr.mxu1 %v78_v1  ;;  %v73_v6 = vld [vmem:[#allocation5 + $0xd0] sm:$0xff]  ;;  %v72_v7 = vld [vmem:[#allocation5 + $0xc8] sm:$0xff]  ;;  %v71_v8 = vld [vmem:[#allocation5 + $0xc0] sm:$0xff]  ;;  %v82_v38 = vshrl.u32 %v81_v37, 7  ;;  %p291_p11 = scmp.lt.s32.totalorder %s194_s27, %s194_s27 }
  0x20   :  { %92 = vmatpush1.msra.mxu0 %v77_v2  ;;  %222 = vmatpush1.msra.mxu1 %v77_v2  ;;  %v70_v9 = vld [vmem:[#allocation5 + $0xb8] sm:$0xff]  ;;  %v69_v10 = vld [vmem:[#allocation5 + $0xb0] sm:$0xff]  ;;  %v68_v11 = vld [vmem:[#allocation5 + $0xa8] sm:$0xff] }
  0x21   :  { %93 = vmatprep.subr.mxu0 %v76_v3  ;;  %207 = vmatprep.subr.mxu1 %v76_v3  ;;  %v67_v12 = vld [vmem:[#allocation5 + $0xa0] sm:$0xff]  ;;  %v66_v13 = vld [vmem:[#allocation5 + $0x98] sm:$0xff]  ;;  %v65_v14 = vld [vmem:[#allocation5 + $0x90] sm:$0xff]  ;;  %v83_v39 = vsub.s32 0, %v82_v38  ;;  %v87_v41 = vsub.s32 1, %v82_v38 }
  0x22   :  { %94 = vmatpush1.msra.mxu0 %v75_v4  ;;  %223 = vmatpush1.msra.mxu1 %v75_v4  ;;  %v64_v15 = vld [vmem:[#allocation5 + $0x88] sm:$0xff]  ;;  %v63_v16 = vld [vmem:[#allocation5 + $0x80] sm:$0xff]  ;;  %v62_v17 = vld [vmem:[#allocation5 + $0x78] sm:$0xff] }
  0x23   :  { %95 = vmatprep.subr.mxu0 %v74_v5  ;;  %208 = vmatprep.subr.mxu1 %v74_v5  ;;  %v61_v18 = vld [vmem:[#allocation5 + $0x70] sm:$0xff]  ;;  %v60_v19 = vld [vmem:[#allocation5 + $0x68] sm:$0xff]  ;;  %v59_v20 = vld [vmem:[#allocation5 + $0x60] sm:$0xff] }
  0x24   :  { %96 = vmatpush1.msra.mxu0 %v73_v6  ;;  %224 = vmatpush1.msra.mxu1 %v73_v6  ;;  %v58_v21 = vld [vmem:[#allocation5 + $0x58] sm:$0xff]  ;;  %v57_v22 = vld [vmem:[#allocation5 + $0x50] sm:$0xff]  ;;  %v56_v23 = vld [vmem:[#allocation5 + $0x48] sm:$0xff] }
  0x25   :  { %97 = vmatprep.subr.mxu0 %v72_v7  ;;  %209 = vmatprep.subr.mxu1 %v72_v7  ;;  %v55_v24 = vld [vmem:[#allocation5 + $0x40] sm:$0xff]  ;;  %v54_v25 = vld [vmem:[#allocation5 + $0x38] sm:$0xff]  ;;  %v53_v26 = vld [vmem:[#allocation5 + $0x30] sm:$0xff] }
  0x26   :  { %98 = vmatpush1.msra.mxu0 %v71_v8  ;;  %225 = vmatpush1.msra.mxu1 %v71_v8  ;;  %v52_v27 = vld [vmem:[#allocation5 + $0x28] sm:$0xff]  ;;  %v51_v28 = vld [vmem:[#allocation5 + $0x20] sm:$0xff]  ;;  %v50_v29 = vld [vmem:[#allocation5 + $0x18] sm:$0xff] }
  0x27   :  { %99 = vmatprep.subr.mxu0 %v70_v9  ;;  %210 = vmatprep.subr.mxu1 %v70_v9  ;;  %v49_v30 = vld [vmem:[#allocation5 + $0x10] sm:$0xff]  ;;  %v48_v31 = vld [vmem:[#allocation5 + $0x8] sm:$0xff]  ;;  %v47_v32 = vld [vmem:[#allocation5] sm:$0xff] }
  0x28   :  { %100 = vmatpush1.msra.mxu0 %v69_v10  ;;  %226 = vmatpush1.msra.mxu1 %v69_v10  ;;  %v43_v33 = vld [vmem:[#allocation2] sm:$0xff]  ;;  %v45_v34 = vld [vmem:[#allocation2 + $0x10] sm:$0xff]  ;;  %v44_v35 = vld [vmem:[#allocation2 + $0x8] sm:$0xff] }
  0x29   :  { %101 = vmatprep.subr.mxu0 %v68_v11  ;;  %211 = vmatprep.subr.mxu1 %v68_v11  ;;  %v46_v36 = vld [vmem:[#allocation2 + $0x18] sm:$0x1]  ;;  %v79_v40 = vld [vmem:[%s364_s2] sm:$0x3]  ;;  %s286_s2 = scalar_lea.vmem %s194_s27, 1024 }
  0x2a   :  { %102 = vmatpush1.msra.mxu0 %v67_v12  ;;  %227 = vmatpush1.msra.mxu1 %v67_v12  ;;  %v84_v42 = vrot.slane %v79_v40, %v83_v39  ;;  %v88_v43 = vrot.slane %v79_v40, %v87_v41  ;;  %p287_p10 = scmp.ne.s32.totalorder %s194_s27, %s286_s2  ;;  %p292_p12 = scmp.lt.s32.totalorder %s286_s2, %s286_s2 }
  0x2b   :  { %103 = vmatprep.subr.mxu0 %v66_v13  ;;  %212 = vmatprep.subr.mxu1 %v66_v13 }
  0x2c   :  { %104 = vmatpush1.msra.mxu0 %v65_v14  ;;  %228 = vmatpush1.msra.mxu1 %v65_v14  ;;  %p293_p13 = por %p292_p12, %p291_p11 }
  0x2d   :  { %105 = vmatprep.subr.mxu0 %v64_v15  ;;  %213 = vmatprep.subr.mxu1 %v64_v15 }
  0x2e   :  { %106 = vmatpush1.msra.mxu0 %v63_v16  ;;  %229 = vmatpush1.msra.mxu1 %v63_v16  ;;  %p294_p0 = pnand %p293_p13, %p287_p10 }
  0x2f   :  { %107 = vmatprep.subr.mxu0 %v62_v17  ;;  %214 = vmatprep.subr.mxu1 %v62_v17 }
  0x30   :  { %108 = vmatpush1.msra.mxu0 %v61_v18  ;;  %230 = vmatpush1.msra.mxu1 %v61_v18 }
  0x31   :  { %109 = vmatprep.subr.mxu0 %v60_v19  ;;  %215 = vmatprep.subr.mxu1 %v60_v19 }
  0x32   :  { %110 = vmatpush1.msra.mxu0 %v59_v20  ;;  %231 = vmatpush1.msra.mxu1 %v59_v20 }
  0x33   :  { %111 = vmatprep.subr.mxu0 %v58_v21  ;;  %216 = vmatprep.subr.mxu1 %v58_v21 }
  0x34   :  { %112 = vmatpush1.msra.mxu0 %v57_v22  ;;  %232 = vmatpush1.msra.mxu1 %v57_v22 }
  0x35   :  { %113 = vmatprep.subr.mxu0 %v56_v23  ;;  %217 = vmatprep.subr.mxu1 %v56_v23 }
  0x36   :  { %114 = vmatpush1.msra.mxu0 %v55_v24  ;;  %233 = vmatpush1.msra.mxu1 %v55_v24 }
  0x37   :  { %115 = vmatprep.subr.mxu0 %v54_v25  ;;  %218 = vmatprep.subr.mxu1 %v54_v25 }
  0x38   :  { %116 = vmatpush1.msra.mxu0 %v53_v26  ;;  %234 = vmatpush1.msra.mxu1 %v53_v26 }
  0x39   :  { %117 = vmatprep.subr.mxu0 %v52_v27  ;;  %219 = vmatprep.subr.mxu1 %v52_v27 }
  0x3a   :  { %118 = vmatpush1.msra.mxu0 %v51_v28  ;;  %235 = vmatpush1.msra.mxu1 %v51_v28 }
  0x3b   :  { %119 = vmatprep.subr.mxu0 %v50_v29  ;;  %220 = vmatprep.subr.mxu1 %v50_v29 }
  0x3c   :  { %120 = vmatpush1.msra.mxu0 %v49_v30  ;;  %236 = vmatpush1.msra.mxu1 %v49_v30 }
  0x3d   :  { %121 = vmatprep.subr.mxu0 %v48_v31  ;;  %221 = vmatprep.subr.mxu1 %v48_v31 }
  0x3e   :  { %122 = vmatpush1.msra.mxu0 %v47_v32  ;;  %237 = vmatpush1.msra.mxu1 %v47_v32 }
  0x3f   :  { %156 = vmatmul.mubr.f32.vlgmr.msra.gmra.mxu0 %v43_v33  ;;  %168 = vmatmul.mubr.f32.vlgmr.msra.gmra.mxu1 %v45_v34 }
  0x40   :  { %161 = vmatprep.mubr.f32.mxu0 %v318_v0  ;;  %173 = vmatprep.mubr.f32.mxu1 %v318_v0 }
  0x43   :  { %162 = vmatmul.mubr.f32.gmra.mxu0 %v44_v35  ;;  %174 = vmatmul.mubr.f32.gmra.mxu1 %v46_v36 }
  0xff   :  { %v157_v44 = vpop.f32.mrf.mxu0  ;;  %v169_v45 = vpop.f32.mrf.mxu1 }
 0x100   :  { %v158_v46 = vadd.f32 %v157_v44, %v84_v42  ;;  %v170_v47 = vadd.f32 %v169_v45, %v84_v42 }
 0x101   :  { %v159_v48 = vpop.f32.mrf.mxu0  ;;  %v171_v49 = vpop.f32.mrf.mxu1 }
 0x102   :  { %180 = vst [vmem:[#allocation7] sm:$0xff] %v158_v46  ;;  %184 = vst [vmem:[#allocation7 + $0x20] sm:$0xff] %v170_v47  ;;  %v160_v50 = vadd.f32 %v159_v48, %v88_v43  ;;  %v172_v51 = vadd.f32 %v171_v49, %v88_v43 }
 0x103   :  { %v163_v52 = vpop.f32.mrf.mxu0  ;;  %v175_v53 = vpop.f32.mrf.mxu1 }
 0x104   :  { %181 = vst [vmem:[#allocation7 + $0x8] sm:$0xff] %v160_v50  ;;  %185 = vst [vmem:[#allocation7 + $0x28] sm:$0xff] %v172_v51  ;;  %v164_v54 = vadd.f32 %v163_v52, %v84_v42  ;;  %v176_v55 = vadd.f32 %v175_v53, %v84_v42 }
 0x105   :  { %v165_v56 = vpop.f32.mrf.mxu0  ;;  %v177_v57 = vpop.f32.mrf.mxu1 }
 0x106   :  { %182 = vst [vmem:[#allocation7 + $0x10] sm:$0xff] %v164_v54  ;;  %186 = vst [vmem:[#allocation7 + $0x30] sm:$0x1] %v176_v55  ;;  %v166_v58 = vadd.f32 %v165_v56, %v88_v43  ;;  %v178_v59 = vadd.f32 %v177_v57, %v88_v43 }
 0x108   :  { %183 = vst [vmem:[#allocation7 + $0x18] sm:$0xff] %v166_v58  ;;  %187 = vst [vmem:[#allocation7 + $0x38] sm:$0x1] %v178_v59 }
 0x109   :  { %297 = shalt.err (!%p294_p0)
}
 0x10a   :  { %199 = dma.vmem_to_hbm [thread:$0]  %s194_s27, 1024, %s365_s3, [#allocation4], %s316_s22, %s316_s22, %s317_s23  }
 0x10b   :  { %310 = dma.done.wait [#allocation4], 1024  }
 0x10c   :  { %311 = vsyncadd [#allocation4], 4294966272 }
 0x10d   :  { %203 = vsyncpa [#allocation3], 1 }
 0x10e   :  { %204 = vsyncpa [#allocation6], 1 }
 0x10f   :  { %205 = vsyncpa [#allocation4], 1 }

</bundles_post_ra>
